<compile_context>
chip_gen: v6e
topology: v6e:2x2x1
jax: 0.10.0
libtpu: 0.0.40
codegen_flags: <defaults>
</compile_context>

<pallas_src>
import jax
import jax.numpy as jnp
from jax.experimental import pallas as pl
from jax.experimental.pallas import tpu as pltpu


def svm_linear_kernel(x_ref, wt_ref, b_ref, o_ref):
    # x_ref: (TB, K), wt_ref: (K, N), b_ref: (1, N), o_ref: (TB, N)
    y = jnp.dot(x_ref[...], wt_ref[...], preferred_element_type=jnp.float32)
    o_ref[...] = (y + b_ref[...]).astype(o_ref.dtype)


def svm_forward(x, weight, bias, *, block_b=1024):
    """y = x @ weight.T + bias, with weight given as (out_features, in_features)."""
    B, K = x.shape           # (batch, 30)
    N, K2 = weight.shape     # (2, 30)
    assert K == K2

    # Wrapper-side layout plumbing (free): contraction axis last -> (K, N).
    w_t = weight.T
    bias2d = bias.reshape(1, N)

    # Batch tile: full extent for small B (always legal under the (8,128)
    # rule), otherwise a multiple-of-8 tile so rows map cleanly to sublanes.
    if B <= block_b:
        TB = B
    else:
        TB = max(8, (block_b // 8) * 8)
    grid = (pl.cdiv(B, TB),)

    return pl.pallas_call(
        svm_linear_kernel,
        out_shape=jax.ShapeDtypeStruct((B, N), x.dtype),
        grid=grid,
        in_specs=[
            pl.BlockSpec((TB, K), lambda i: (i, 0)),   # x: streamed over batch
            pl.BlockSpec((K, N), lambda i: (0, 0)),    # W^T: resident
            pl.BlockSpec((1, N), lambda i: (0, 0)),    # bias: resident
        ],
        out_specs=pl.BlockSpec((TB, N), lambda i: (i, 0)),
        compiler_params=pltpu.CompilerParams(
            dimension_semantics=("parallel",)),
    )(x, w_t, bias2d)


if __name__ == "__main__":
    key = jax.random.PRNGKey(0)
    kx, kw, kb, kx2 = jax.random.split(key, 4)

    IN, OUT = 30, 2
    # Deterministic init mirroring nn.Linear's uniform(-1/sqrt(in), 1/sqrt(in))
    bound = 1.0 / (IN ** 0.5)
    weight = jax.random.uniform(kw, (OUT, IN), minval=-bound, maxval=bound,
                                dtype=jnp.float32)
    bias = jax.random.uniform(kb, (OUT,), minval=-bound, maxval=bound,
                              dtype=jnp.float32)

    # Small-shape test matching the module (batch=8 samples of 30 features).
    B = 8
    x = jax.random.normal(kx, (B, IN), dtype=jnp.float32)
    out = svm_forward(x, weight, bias)
    jax.block_until_ready(out)
    ref = x @ weight.T + bias
    assert out.shape == (B, OUT)
    assert jnp.allclose(out, ref, atol=1e-5, rtol=1e-5)

    # Exercise the tiled/pipelined path (grid > 1) with a larger batch.
    B2 = 2048
    x2 = jax.random.normal(kx2, (B2, IN), dtype=jnp.float32)
    out2 = svm_forward(x2, weight, bias, block_b=512)
    jax.block_until_ready(out2)
    ref2 = x2 @ weight.T + bias
    assert out2.shape == (B2, OUT)
    assert jnp.allclose(out2, ref2, atol=1e-5, rtol=1e-5)

    print("KERNEL_OK")
</pallas_src>

<mosaic_0001>
module attributes {stable_mosaic.version = 11 : i64} {
  func.func @svm_linear_kernel(%arg0: i32, %arg1: memref<8x30xf32, #tpu.memory_space<vmem>>, %arg2: memref<30x2xf32, #tpu.memory_space<vmem>>, %arg3: memref<1x2xf32, #tpu.memory_space<vmem>>, %arg4: memref<8x2xf32, #tpu.memory_space<vmem>>) attributes {dimension_semantics = [#tpu.dimension_semantics<parallel>], iteration_bounds = array<i64: 1>, scalar_prefetch = 0 : i64, scratch_operands = 0 : i64, tpu.core_type = #tpu.core_type<tc>, window_params = [{transform_indices = @transform_0, window_bounds = array<i64: 8, 30>}, {pipeline_mode = #tpu.pipeline_mode<synchronous>, transform_indices = @transform_1, window_bounds = array<i64: 30, 2>}, {pipeline_mode = #tpu.pipeline_mode<synchronous>, transform_indices = @transform_2, window_bounds = array<i64: 1, 2>}, {transform_indices = @transform_3, window_bounds = array<i64: 8, 2>}]} {
    %c0 = arith.constant 0 : index
    %c0_0 = arith.constant 0 : index
    %0 = vector.load %arg1[%c0, %c0_0] : memref<8x30xf32, #tpu.memory_space<vmem>>, vector<8x30xf32>
    %c0_1 = arith.constant 0 : index
    %c0_2 = arith.constant 0 : index
    %1 = vector.load %arg2[%c0_1, %c0_2] : memref<30x2xf32, #tpu.memory_space<vmem>>, vector<30x2xf32>
    %cst = arith.constant dense<0.000000e+00> : vector<8x2xf32>
    %2 = tpu.matmul %0, %1, %cst {dimension_numbers = #tpu.dot_dimension_numbers<[1], [0], [0], [1], [0, 0, 1, 1], [], []>} : vector<8x30xf32>, vector<30x2xf32>, vector<8x2xf32> -> vector<8x2xf32>
    %c0_3 = arith.constant 0 : index
    %c0_4 = arith.constant 0 : index
    %3 = vector.load %arg3[%c0_3, %c0_4] : memref<1x2xf32, #tpu.memory_space<vmem>>, vector<1x2xf32>
    %4 = vector.broadcast %3 : vector<1x2xf32> to vector<8x2xf32>
    %5 = arith.addf %2, %4 : vector<8x2xf32>
    %c0_5 = arith.constant 0 : index
    %c0_6 = arith.constant 0 : index
    %6 = vector.load %arg4[%c0_5, %c0_6] : memref<8x2xf32, #tpu.memory_space<vmem>>, vector<8x2xf32>
    tpu.vector_store %arg4[%c0_5, %c0_6], %5 {strides = array<i32>} : memref<8x2xf32, #tpu.memory_space<vmem>>, vector<8x2xf32>,
    return
  }
  func.func @transform_0(%arg0: i32) -> (i32, i32) {
    %c0_i32 = arith.constant 0 : i32
    %c0_i32_0 = arith.constant 0 : i32
    return %arg0, %c0_i32 : i32, i32
  }
  func.func @transform_1(%arg0: i32) -> (i32, i32) {
    %c0_i32 = arith.constant 0 : i32
    %c0_i32_0 = arith.constant 0 : i32
    %c0_i32_1 = arith.constant 0 : i32
    return %c0_i32, %c0_i32_0 : i32, i32
  }
  func.func @transform_2(%arg0: i32) -> (i32, i32) {
    %c0_i32 = arith.constant 0 : i32
    %c0_i32_0 = arith.constant 0 : i32
    %c0_i32_1 = arith.constant 0 : i32
    return %c0_i32, %c0_i32_0 : i32, i32
  }
  func.func @transform_3(%arg0: i32) -> (i32, i32) {
    %c0_i32 = arith.constant 0 : i32
    %c0_i32_0 = arith.constant 0 : i32
    return %arg0, %c0_i32 : i32, i32
  }
}

</mosaic_0001>

<bundles_post_ra>
// kernel: tpu_custom_call.1
= control target key start
LH: loop header
LB: loop body
LE: loop exit
PB: predicated region body
PF: predicated region fallthrough
CT: control target
= control target key end

     0   :  { %vm30_vm0 = vcmask 1045504   ;;  %v131_v0 = vmov 0.0   ;;  %vm132_vm1 = vmmov 0   ;;  %vm26_vm2 = vcmask 244736   ;;  %s174_s1 = inlined_call_operand.vmem [shape: f32[30,2], index: 1, kind: input, shape index: {}]   ;;  %s175_s0 = inlined_call_operand.vmem [shape: f32[8,30], index: 0, kind: input, shape index: {}]   ;;  %s176_s2 = inlined_call_operand.vmem [shape: f32[1,2], index: 2, kind: input, shape index: {}]   ;;  %s177_s3 = inlined_call_operand.vmem [shape: f32[8,2], index: 3, kind: output, shape index: {}]  }
   0x1   :  { %118 = vmatprep.subr.mxu0 %v131_v0  ;;  %v18_v1 = vld [vmem:[%s174_s1 + $0x18] sm:$0x3f]  ;;  %v17_v2 = vld [vmem:[%s174_s1 + $0x10] sm:$0xff]  ;;  %126 = vmatprep.mubr.msk.f32.mxu0 %vm132_vm1, %v131_v0  ;;  %v16_v3 = vld [vmem:[%s174_s1 + $0x8] sm:$0xff]  ;;  %vm104_vm3 = vcmask 15360  }
   0x2   :  { %119 = vmatpush3.msk.msra.mxu0 %vm30_vm0, %v18_v1  ;;  %v15_v4 = vld [vmem:[%s174_s1] sm:$0xff] }
   0x3   :  { %120 = vmatprep.subr.mxu0 %v131_v0  ;;  %v14_v5 = vld [vmem:[%s175_s0] sm:$0xff] }
   0x4   :  { %121 = vmatpush3.msra.mxu0 %v17_v2  ;;  %v110_v6 = vld [vmem:[%s176_s2] ss:$0 sm:$0xff] }
   0x5   :  { %122 = vmatprep.subr.mxu0 %v131_v0 }
   0x6   :  { %123 = vmatpush3.msra.mxu0 %v16_v3 }
   0x7   :  { %124 = vmatprep.subr.mxu0 %v131_v0 }
   0x8   :  { %125 = vmatpush3.msra.mxu0 %v15_v4 }
   0x9   :  { %127 = vmatmul.mubr.msk.f32.vlgmr.msra.gmra.mxu0 %vm26_vm2, %v14_v5 }
  0xc9   :  { %v100_v7 = vpop.f32.mrf.mxu0 }
  0xca   :  { %v101_v8 = vadd.f32 %v110_v6, %v100_v7 }
  0xcb   :  { %v128_v9 = vpop.f32.mrf.mxu0 }
  0xcc   :  { %105 = vst.msk [vmem:[%s177_s3] sm:$0xff] %vm104_vm3, %v101_v8 }

</bundles_post_ra>
